<compile_context>
chip_gen: v5e
topology: v5e:2x2
jax: 0.10.0
libtpu: 0.0.40
codegen_flags: <defaults>
</compile_context>

<pallas_src>
import functools

import jax
import jax.numpy as jnp
from jax.experimental import pallas as pl
from jax.experimental.pallas import tpu as pltpu


_SQRT_2_OVER_PI = 0.7978845608028654  # sqrt(2/pi), hoisted constant


def _ffn_kernel(x_ref, w1_ref, b1_ref, w2_ref, b2_ref, o_ref, acc_ref):
    # x_ref:  (tm, Dp)   bf16      w1_ref: (Dp, th) bf16    b1_ref: (1, th) f32
    # w2_ref: (th, Dp)   bf16      b2_ref: (1, Dp)  f32
    # o_ref:  (tm, Dp)   f32       acc_ref: (tm, Dp) f32 scratch
    h_idx = pl.program_id(1)

    @pl.when(h_idx == 0)
    def _init():
        acc_ref[...] = jnp.zeros_like(acc_ref)

    # First linear on this hidden tile: (tm, Dp) @ (Dp, th) -> (tm, th), f32 acc.
    h = jnp.dot(x_ref[...], w1_ref[...],
                preferred_element_type=jnp.float32) + b1_ref[...]

    # tanh-GELU, math kept in f32 (v5e has no bf16 VPU/EUP).
    # 0.5*h*(1 + tanh(c*(h + 0.044715*h^3))), with h^3 fused as h*h*(0.044715*h).
    inner = h + h * h * (0.044715 * h)
    g = 0.5 * h * (1.0 + jnp.tanh(_SQRT_2_OVER_PI * inner))

    # Second linear partial sum over this hidden tile: (tm, th) @ (th, Dp).
    acc_ref[...] += jnp.dot(g.astype(w2_ref.dtype), w2_ref[...],
                            preferred_element_type=jnp.float32)

    @pl.when(h_idx == pl.num_programs(1) - 1)
    def _finalize():
        o_ref[...] = (acc_ref[...] + b2_ref[...]).astype(o_ref.dtype)


def _round_up(a, b):
    return ((a + b - 1) // b) * b


@functools.partial(jax.jit, static_argnames=("tm", "th"))
def feed_forward(x, w1, b1, w2, b2, *, tm=256, th=512):
    """x: (B, T, D) f32. w1: (D, 4D), b1: (4D,), w2: (4D, D), b2: (D,)."""
    B, T, D = x.shape
    H = w1.shape[1]
    M = B * T
    compute_dtype = jnp.bfloat16  # MXU operand dtype; accumulation stays f32.

    # Pad to hardware-friendly shapes: lanes multiple of 128, sublanes of 8.
    D_pad = _round_up(D, 128)
    tm = min(tm, _round_up(M, 8))
    M_pad = _round_up(M, tm)
    th = min(th, _round_up(H, 128))
    H_pad = _round_up(H, th)

    x2d = x.reshape(M, D)
    x_p = jnp.zeros((M_pad, D_pad), compute_dtype).at[:M, :D].set(
        x2d.astype(compute_dtype))
    w1_p = jnp.zeros((D_pad, H_pad), compute_dtype).at[:D, :H].set(
        w1.astype(compute_dtype))
    b1_p = jnp.zeros((1, H_pad), jnp.float32).at[0, :H].set(
        b1.astype(jnp.float32))
    w2_p = jnp.zeros((H_pad, D_pad), compute_dtype).at[:H, :D].set(
        w2.astype(compute_dtype))
    b2_p = jnp.zeros((1, D_pad), jnp.float32).at[0, :D].set(
        b2.astype(jnp.float32))

    grid = (M_pad // tm, H_pad // th)

    cost = pl.CostEstimate(
        flops=4 * M * D * H,            # two matmuls, 2*M*D*H each
        transcendentals=M * H,          # one tanh per hidden activation
        bytes_accessed=(M * D + D * H + H * D) * 2   # bf16 x, w1, w2
                       + (H + D) * 4                 # f32 biases
                       + M * D * 4,                  # f32 output
    )

    out2d = pl.pallas_call(
        _ffn_kernel,
        out_shape=jax.ShapeDtypeStruct((M_pad, D_pad), x.dtype),
        grid_spec=pltpu.PrefetchScalarGridSpec(
            num_scalar_prefetch=0,
            grid=grid,
            in_specs=[
                pl.BlockSpec((tm, D_pad), lambda i, h: (i, 0)),   # x rows
                pl.BlockSpec((D_pad, th), lambda i, h: (0, h)),   # w1 hidden tile
                pl.BlockSpec((1, th),     lambda i, h: (0, h)),   # b1 hidden tile
                pl.BlockSpec((th, D_pad), lambda i, h: (h, 0)),   # w2 hidden tile
                pl.BlockSpec((1, D_pad),  lambda i, h: (0, 0)),   # b2
            ],
            out_specs=pl.BlockSpec((tm, D_pad), lambda i, h: (i, 0)),
            scratch_shapes=[pltpu.VMEM((tm, D_pad), jnp.float32)],
        ),
        compiler_params=pltpu.CompilerParams(
            # Rows are independent (megacore-shardable); hidden is a reduction.
            dimension_semantics=("parallel", "arbitrary"),
            vmem_limit_bytes=64 * 1024 * 1024,
        ),
        cost_estimate=cost,
    )(x_p, w1_p, b1_p, w2_p, b2_p)

    return out2d[:M, :D].reshape(B, T, D)


def _reference_ffn(x, w1, b1, w2, b2):
    h = x @ w1 + b1
    c = jnp.sqrt(2.0 / jnp.pi)
    g = 0.5 * h * (1.0 + jnp.tanh(c * (h + 0.044715 * h ** 3)))
    return g @ w2 + b2


if __name__ == "__main__":
    # cfg: emb_dim=32 -> hidden = 4*32 = 128
    B, T, D = 2, 8, 32
    H = 4 * D

    key = jax.random.PRNGKey(0)
    kx, k1, kb1, k2, kb2 = jax.random.split(key, 5)

    x = jax.random.normal(kx, (B, T, D), dtype=jnp.float32)
    # Parameters in (in, out) layout (transposed vs. nn.Linear.weight).
    w1 = jax.random.normal(k1, (D, H), dtype=jnp.float32) * 0.05
    b1 = jax.random.normal(kb1, (H,), dtype=jnp.float32) * 0.01
    w2 = jax.random.normal(k2, (H, D), dtype=jnp.float32) * 0.05
    b2 = jax.random.normal(kb2, (D,), dtype=jnp.float32) * 0.01

    out = feed_forward(x, w1, b1, w2, b2)
    jax.block_until_ready(out)

    ref = _reference_ffn(x, w1, b1, w2, b2)
    assert out.shape == (B, T, D)
    # bf16 MXU operands -> looser tolerance than pure-f32 (expected quantization).
    assert jnp.allclose(out, ref, atol=2e-2, rtol=2e-2), "mismatch vs reference"

    print("KERNEL_OK")
</pallas_src>

<mosaic_0001>
module attributes {stable_mosaic.version = 11 : i64} {
  func.func @_ffn_kernel(%arg0: i32, %arg1: i32, %arg2: memref<16x128xbf16, #tpu.memory_space<vmem>>, %arg3: memref<128x128xbf16, #tpu.memory_space<vmem>>, %arg4: memref<1x128xf32, #tpu.memory_space<vmem>>, %arg5: memref<128x128xbf16, #tpu.memory_space<vmem>>, %arg6: memref<1x128xf32, #tpu.memory_space<vmem>>, %arg7: memref<16x128xf32, #tpu.memory_space<vmem>>, %arg8: memref<16x128xf32, #tpu.memory_space<vmem>>) attributes {dimension_semantics = [#tpu.dimension_semantics<parallel>, #tpu.dimension_semantics<arbitrary>], iteration_bounds = array<i64: 1, 1>, scalar_prefetch = 0 : i64, scratch_operands = 1 : i64, tpu.core_type = #tpu.core_type<tc>, window_params = [{transform_indices = @transform_0, window_bounds = array<i64: 16, 128>}, {transform_indices = @transform_1, window_bounds = array<i64: 128, 128>}, {transform_indices = @transform_2, window_bounds = array<i64: 1, 128>}, {transform_indices = @transform_3, window_bounds = array<i64: 128, 128>}, {pipeline_mode = #tpu.pipeline_mode<synchronous>, transform_indices = @transform_4, window_bounds = array<i64: 1, 128>}, {transform_indices = @transform_5, window_bounds = array<i64: 16, 128>}]} {
    %c0_i32 = arith.constant 0 : i32
    %0 = arith.cmpi eq, %arg1, %c0_i32 : i32
    %1 = arith.extui %0 : i1 to i32
    %c0_i32_0 = arith.constant 0 : i32
    %2 = arith.cmpi ne, %1, %c0_i32_0 : i32
    scf.if %2 {
      %cst_19 = arith.constant 0.000000e+00 : f32
      %31 = vector.broadcast %cst_19 : f32 to vector<16x128xf32>
      %c0_20 = arith.constant 0 : index
      %c0_21 = arith.constant 0 : index
      %32 = vector.load %arg8[%c0_20, %c0_21] : memref<16x128xf32, #tpu.memory_space<vmem>>, vector<16x128xf32>
      tpu.vector_store %arg8[%c0_20, %c0_21], %31 {strides = array<i32>} : memref<16x128xf32, #tpu.memory_space<vmem>>, vector<16x128xf32>,
    } else {
    }
    %c0 = arith.constant 0 : index
    %c0_1 = arith.constant 0 : index
    %3 = vector.load %arg2[%c0, %c0_1] : memref<16x128xbf16, #tpu.memory_space<vmem>>, vector<16x128xbf16>
    %c0_2 = arith.constant 0 : index
    %c0_3 = arith.constant 0 : index
    %4 = vector.load %arg3[%c0_2, %c0_3] : memref<128x128xbf16, #tpu.memory_space<vmem>>, vector<128x128xbf16>
    %cst = arith.constant dense<0.000000e+00> : vector<16x128xf32>
    %5 = tpu.matmul %3, %4, %cst {dimension_numbers = #tpu.dot_dimension_numbers<[1], [0], [0], [1], [0, 0, 1, 1], [], []>} : vector<16x128xbf16>, vector<128x128xbf16>, vector<16x128xf32> -> vector<16x128xf32>
    %c0_4 = arith.constant 0 : index
    %c0_5 = arith.constant 0 : index
    %6 = vector.load %arg4[%c0_4, %c0_5] : memref<1x128xf32, #tpu.memory_space<vmem>>, vector<1x128xf32>
    %7 = vector.broadcast %6 : vector<1x128xf32> to vector<16x128xf32>
    %8 = arith.addf %5, %7 : vector<16x128xf32>
    %9 = arith.mulf %8, %8 : vector<16x128xf32>
    %cst_6 = arith.constant 4.471500e-02 : f32
    %10 = vector.broadcast %cst_6 : f32 to vector<16x128xf32>
    %11 = arith.mulf %10, %8 : vector<16x128xf32>
    %12 = arith.mulf %9, %11 : vector<16x128xf32>
    %13 = arith.addf %8, %12 : vector<16x128xf32>
    %cst_7 = arith.constant 5.000000e-01 : f32
    %14 = vector.broadcast %cst_7 : f32 to vector<16x128xf32>
    %15 = arith.mulf %14, %8 : vector<16x128xf32>
    %cst_8 = arith.constant 0.797884583 : f32
    %16 = vector.broadcast %cst_8 : f32 to vector<16x128xf32>
    %17 = arith.mulf %16, %13 : vector<16x128xf32>
    %18 = math.tanh %17 : vector<16x128xf32>
    %cst_9 = arith.constant 1.000000e+00 : f32
    %19 = vector.broadcast %cst_9 : f32 to vector<16x128xf32>
    %20 = arith.addf %19, %18 : vector<16x128xf32>
    %21 = arith.mulf %15, %20 : vector<16x128xf32>
    %c0_10 = arith.constant 0 : index
    %c0_11 = arith.constant 0 : index
    %22 = vector.load %arg8[%c0_10, %c0_11] : memref<16x128xf32, #tpu.memory_space<vmem>>, vector<16x128xf32>
    %23 = arith.truncf %21 : vector<16x128xf32> to vector<16x128xbf16>
    %c0_12 = arith.constant 0 : index
    %c0_13 = arith.constant 0 : index
    %24 = vector.load %arg5[%c0_12, %c0_13] : memref<128x128xbf16, #tpu.memory_space<vmem>>, vector<128x128xbf16>
    %cst_14 = arith.constant dense<0.000000e+00> : vector<16x128xf32>
    %25 = tpu.matmul %23, %24, %cst_14 {dimension_numbers = #tpu.dot_dimension_numbers<[1], [0], [0], [1], [0, 0, 1, 1], [], []>} : vector<16x128xbf16>, vector<128x128xbf16>, vector<16x128xf32> -> vector<16x128xf32>
    %26 = arith.addf %22, %25 : vector<16x128xf32>
    %c0_15 = arith.constant 0 : index
    %c0_16 = arith.constant 0 : index
    %27 = vector.load %arg8[%c0_15, %c0_16] : memref<16x128xf32, #tpu.memory_space<vmem>>, vector<16x128xf32>
    tpu.vector_store %arg8[%c0_15, %c0_16], %26 {strides = array<i32>} : memref<16x128xf32, #tpu.memory_space<vmem>>, vector<16x128xf32>,
    %c0_i32_17 = arith.constant 0 : i32
    %28 = arith.cmpi eq, %arg1, %c0_i32_17 : i32
    %29 = arith.extui %28 : i1 to i32
    %c0_i32_18 = arith.constant 0 : i32
    %30 = arith.cmpi ne, %29, %c0_i32_18 : i32
    scf.if %30 {
      %c0_19 = arith.constant 0 : index
      %c0_20 = arith.constant 0 : index
      %31 = vector.load %arg8[%c0_19, %c0_20] : memref<16x128xf32, #tpu.memory_space<vmem>>, vector<16x128xf32>
      %c0_21 = arith.constant 0 : index
      %c0_22 = arith.constant 0 : index
      %32 = vector.load %arg6[%c0_21, %c0_22] : memref<1x128xf32, #tpu.memory_space<vmem>>, vector<1x128xf32>
      %33 = vector.broadcast %32 : vector<1x128xf32> to vector<16x128xf32>
      %34 = arith.addf %31, %33 : vector<16x128xf32>
      %c0_23 = arith.constant 0 : index
      %c0_24 = arith.constant 0 : index
      %35 = vector.load %arg7[%c0_23, %c0_24] : memref<16x128xf32, #tpu.memory_space<vmem>>, vector<16x128xf32>
      tpu.vector_store %arg7[%c0_23, %c0_24], %34 {strides = array<i32>} : memref<16x128xf32, #tpu.memory_space<vmem>>, vector<16x128xf32>,
    } else {
    }
    return
  }
  func.func @transform_0(%arg0: i32, %arg1: i32) -> (i32, i32) {
    %c0_i32 = arith.constant 0 : i32
    %c0_i32_0 = arith.constant 0 : i32
    return %arg0, %c0_i32 : i32, i32
  }
  func.func @transform_1(%arg0: i32, %arg1: i32) -> (i32, i32) {
    %c0_i32 = arith.constant 0 : i32
    %c0_i32_0 = arith.constant 0 : i32
    return %c0_i32, %arg1 : i32, i32
  }
  func.func @transform_2(%arg0: i32, %arg1: i32) -> (i32, i32) {
    %c0_i32 = arith.constant 0 : i32
    %c0_i32_0 = arith.constant 0 : i32
    return %c0_i32, %arg1 : i32, i32
  }
  func.func @transform_3(%arg0: i32, %arg1: i32) -> (i32, i32) {
    %c0_i32 = arith.constant 0 : i32
    %c0_i32_0 = arith.constant 0 : i32
    return %arg1, %c0_i32 : i32, i32
  }
  func.func @transform_4(%arg0: i32, %arg1: i32) -> (i32, i32) {
    %c0_i32 = arith.constant 0 : i32
    %c0_i32_0 = arith.constant 0 : i32
    %c0_i32_1 = arith.constant 0 : i32
    return %c0_i32, %c0_i32_0 : i32, i32
  }
  func.func @transform_5(%arg0: i32, %arg1: i32) -> (i32, i32) {
    %c0_i32 = arith.constant 0 : i32
    %c0_i32_0 = arith.constant 0 : i32
    return %arg0, %c0_i32 : i32, i32
  }
}

</mosaic_0001>

<bundles_post_ra>
// kernel: feed_forward.1
= control target key start
LH: loop header
LB: loop body
LE: loop exit
PB: predicated region body
PF: predicated region fallthrough
CT: control target
= control target key end

     0   :  { %s420_s1 = inlined_call_operand.vmem [shape: bf16[128,128], index: 1, kind: input, shape index: {}]   ;;  %s421_s2 = inlined_call_operand.vmem [shape: f32[1,128], index: 2, kind: input, shape index: {}]   ;;  %s422_s0 = inlined_call_operand.vmem [shape: bf16[16,128], index: 0, kind: input, shape index: {}]   ;;  %s423_s4 = inlined_call_operand.vmem [shape: f32[1,128], index: 4, kind: input, shape index: {}]   ;;  %s424_s3 = inlined_call_operand.vmem [shape: bf16[128,128], index: 3, kind: input, shape index: {}]   ;;  %s425_s5 = inlined_call_operand.vmem [shape: f32[16,128], index: 5, kind: output, shape index: {}]  }
   0x1   :  { %v312_v0 = vld [vmem:[%s420_s1 + $0x38] sm:$0xff]  ;;  %v311_v1 = vld [vmem:[%s420_s1 + $0x30] sm:$0xff]  ;;  %v310_v2 = vld [vmem:[%s420_s1 + $0x28] sm:$0xff] }
   0x2   :  { %102 = vmatpush.bf16.msra.mxu0 %v312_v0  ;;  %v309_v3 = vld [vmem:[%s420_s1 + $0x20] sm:$0xff]  ;;  %v308_v4 = vld [vmem:[%s420_s1 + $0x18] sm:$0xff]  ;;  %v307_v5 = vld [vmem:[%s420_s1 + $0x10] sm:$0xff] }
   0x3   :  { %v306_v6 = vld [vmem:[%s420_s1 + $0x8] sm:$0xff]  ;;  %v305_v7 = vld [vmem:[%s420_s1] sm:$0xff]  ;;  %v320_v9 = vld [vmem:[%s424_s3 + $0x38] sm:$0xff] }
   0x4   :  { %v304_v8 = vld [vmem:[%s422_s0] sm:$0xff]  ;;  %201 = vmatpush.bf16.msra.mxu1 %v320_v9  ;;  %v319_v10 = vld [vmem:[%s424_s3 + $0x30] sm:$0xff]  ;;  %v318_v11 = vld [vmem:[%s424_s3 + $0x28] sm:$0xff] }
   0x5   :  { %v317_v12 = vld [vmem:[%s424_s3 + $0x20] sm:$0xff]  ;;  %v316_v13 = vld [vmem:[%s424_s3 + $0x18] sm:$0xff]  ;;  %v315_v14 = vld [vmem:[%s424_s3 + $0x10] sm:$0xff] }
   0x6   :  { %103 = vmatpush.bf16.msra.mxu0 %v311_v1  ;;  %v314_v15 = vld [vmem:[%s424_s3 + $0x8] sm:$0xff]  ;;  %v313_v16 = vld [vmem:[%s424_s3] sm:$0xff] }
   0x7   :  { %v321_v17 = vld [vmem:[%s421_s2] ss:$0 sm:$0xff] }
   0x8   :  { %202 = vmatpush.bf16.msra.mxu1 %v319_v10  ;;  %v322_v41 = vld [vmem:[%s423_s4] ss:$0 sm:$0xff] }
   0xa   :  { %104 = vmatpush.bf16.msra.mxu0 %v310_v2 }
   0xc   :  { %203 = vmatpush.bf16.msra.mxu1 %v318_v11 }
   0xe   :  { %105 = vmatpush.bf16.msra.mxu0 %v309_v3 }
  0x10   :  { %204 = vmatpush.bf16.msra.mxu1 %v317_v12 }
  0x12   :  { %106 = vmatpush.bf16.msra.mxu0 %v308_v4 }
  0x14   :  { %205 = vmatpush.bf16.msra.mxu1 %v316_v13 }
  0x16   :  { %107 = vmatpush.bf16.msra.mxu0 %v307_v5 }
  0x18   :  { %206 = vmatpush.bf16.msra.mxu1 %v315_v14 }
  0x1a   :  { %108 = vmatpush.bf16.msra.mxu0 %v306_v6 }
  0x1c   :  { %207 = vmatpush.bf16.msra.mxu1 %v314_v15 }
  0x1e   :  { %109 = vmatpush.bf16.msra.mxu0 %v305_v7 }
  0x20   :  { %208 = vmatpush.bf16.msra.mxu1 %v313_v16 }
  0x21   :  { %110 = vmatmul.bf16.vlgmr.msra.gmra.mxu0 %v304_v8 }
  0x9e   :  { %v111_v18 = vpop.f32.mrf.mxu0 }
  0x9f   :  { %v112_v19 = vadd.f32 %v321_v17, %v111_v18 }
  0xa1   :  { %v116_v20 = vmul.f32 %v112_v19, %v112_v19  ;;  %v118_v21 = vmul.f32 0.044715, %v112_v19  ;;  %v124_v35 = vmul.f32 0.5, %v112_v19 }
  0xa3   :  { %v120_v22 = vmul.f32 %v118_v21, %v116_v20 }
  0xa5   :  { %v122_v23 = vadd.f32 %v120_v22, %v112_v19 }
  0xa6   :  { %v113_v24 = vpop.f32.mrf.mxu0 }
  0xa7   :  { %v114_v25 = vadd.f32 %v321_v17, %v113_v24  ;;  %v126_v28 = vmul.f32 0.7978846, %v122_v23 }
  0xa9   :  { %v117_v26 = vmul.f32 %v114_v25, %v114_v25  ;;  %v119_v27 = vmul.f32 0.044715, %v114_v25  ;;  %323 = vtanh.f32 %v126_v28  ;;  %v125_v36 = vmul.f32 0.5, %v114_v25 }
  0xab   :  { %v121_v29 = vmul.f32 %v119_v27, %v117_v26 }
  0xad   :  { %v123_v30 = vadd.f32 %v121_v29, %v114_v25 }
  0xaf   :  { %v127_v31 = vmul.f32 0.7978846, %v123_v30  ;;  %v324_v32 = vpop.eup %323 }
  0xb0   :  { %v130_v33 = vadd.f32 1.0, %v324_v32 }
  0xb1   :  { %325 = vtanh.f32 %v127_v31 }
  0xb2   :  { %v132_v38 = vmul.f32 %v130_v33, %v124_v35 }
  0xb7   :  { %v326_v34 = vpop.eup %325 }
  0xb8   :  { %v131_v37 = vadd.f32 1.0, %v326_v34 }
  0xba   :  { %v133_v39 = vmul.f32 %v131_v37, %v125_v36 }
  0xbc   :  { %v136_v40 = vpack.c.bf16 %v133_v39, %v132_v38 }
  0xbe   :  { %209 = vmatmul.bf16.vlgmr.msra.gmra.mxu1 %v136_v40 }
 0x13b   :  { %v210_v42 = vpop.f32.mrf.mxu1 }
 0x13c   :  { %v228_v43 = vadd.f32 %v322_v41, %v210_v42 }
 0x13e   :  { %230 = vst [vmem:[%s425_s5] sm:$0xff] %v228_v43 }
 0x143   :  { %v212_v44 = vpop.f32.mrf.mxu1 }
 0x144   :  { %v229_v45 = vadd.f32 %v322_v41, %v212_v44 }
 0x146   :  { %231 = vst [vmem:[%s425_s5 + $0x8] sm:$0xff] %v229_v45 }

</bundles_post_ra>
